<compile_context>
chip_gen: v5e
topology: v5e:2x2
jax: 0.10.0
libtpu: 0.0.40
codegen_flags: <defaults>
</compile_context>

<pallas_src>
import functools

import jax
import jax.numpy as jnp
from jax.experimental import pallas as pl
from jax.experimental.pallas import tpu as pltpu

LAYERS = (2, 32, 32, 1)   # PINN MLP: 2 inputs (x, t) -> 32 -> 32 -> 1 output


def _round_up(x, m):
    return ((x + m - 1) // m) * m


def _default_act_dtype():
    """bf16 activations on v6e/v7x (bf16 EUP/VPU), f32 everywhere else."""
    try:
        kind = jax.devices()[0].device_kind.lower()
    except Exception:
        return jnp.float32
    if "v6" in kind or "v7" in kind:
        return jnp.bfloat16
    return jnp.float32


def pinn_kernel(x_ref, w_ref, o_ref, *, act_dtype):
    # Packed parameter slab (40, 128) f32:
    #   [ 0:32,  0:32] = W2   (32, 32)
    #   [ 0:32, 32:34] = W1'  (32, 2)   (normalization folded in)
    #   [ 0:32, 34:35] = b1'  (32, 1)
    #   [ 0:32, 35:36] = b2   (32, 1)
    #   [32:33,  0:32] = W3   (1, 32)
    #   [32:33, 32:33] = b3   (1, 1)
    slab = w_ref[...]
    w2  = slab[0:32, 0:32]
    w1p = slab[0:32, 32:34]
    b1p = slab[0:32, 34:35]
    b2  = slab[0:32, 35:36]
    w3  = slab[32:33, 0:32]
    b3  = slab[32:33, 32:33]

    x_row = x_ref[0:1, :]                                     # (1, TM) raw x
    t_row = x_ref[1:2, :]                                     # (1, TM) raw t

    # --- layer 1 (in_dim = 2): VPU broadcast mul-adds; normalization pre-folded
    z1 = w1p[:, 0:1] * x_row + w1p[:, 1:2] * t_row + b1p      # (32, TM) f32
    h1 = jnp.tanh(z1.astype(act_dtype))                       # EUP (bf16 on v6e/v7x)

    # --- layer 2: MXU matmul (32,32) @ (32,TM), f32 accumulate ---
    z2 = jnp.dot(w2.astype(act_dtype), h1,
                 preferred_element_type=jnp.float32) + b2     # (32, TM) f32
    h2 = jnp.tanh(z2.astype(act_dtype))

    # --- output layer (no activation): lane-dense (1, TM) store ---
    o_ref[...] = (jnp.dot(w3.astype(act_dtype), h2,
                          preferred_element_type=jnp.float32) + b3)


def pinn_forward(x, t, lb, ub, params, *, tm=8192, act_dtype=None):
    """x, t: (N, 1) float32.  lb, ub: (2,) float32.
    params: (W1,b1,W2,b2,W3,b3) with W_i of shape (out, in), b_i of shape (out, 1).
    Returns (N, 1) float32."""
    N = x.shape[0]
    w1, b1, w2, b2, w3, b3 = params

    if act_dtype is None:
        act_dtype = _default_act_dtype()

    # Fold the affine normalization  Xn = X*scale + shift  into layer 1.
    scale = 2.0 / (ub - lb)                                   # (2,)
    shift = -lb * scale - 1.0                                 # (2,)
    w1p = w1 * scale[None, :]                                 # (32, 2)
    b1p = (w1 @ shift)[:, None] + b1                          # (32, 1)

    # Pack all parameters into one constant-index VMEM slab.
    slab = jnp.zeros((40, 128), jnp.float32)
    slab = slab.at[0:32, 0:32].set(w2)
    slab = slab.at[0:32, 32:34].set(w1p)
    slab = slab.at[0:32, 34:35].set(b1p)
    slab = slab.at[0:32, 35:36].set(b2)
    slab = slab.at[32:33, 0:32].set(w3)
    slab = slab.at[32:33, 32:33].set(b3)

    # Fused, transposed input: row 0 = x, row 1 = t  ->  (2, N)
    X = jnp.concatenate([x, t], axis=-1).T

    # Tile selection: lane-multiple tiles, and >= 2 grid steps whenever N allows
    # so the "parallel" grid axis shards across both v7x TensorCores.
    tm_eff = min(tm, max(128, _round_up(pl.cdiv(N, 2), 128)))
    n_tiles = pl.cdiv(N, tm_eff)
    Np = n_tiles * tm_eff
    if Np != N:
        X = jnp.pad(X, ((0, 0), (0, Np - N)))

    cost = pl.CostEstimate(
        flops=2 * Np * (2 * 32 + 32 * 32 + 32 * 1),
        transcendentals=64 * Np,
        bytes_accessed=(2 + 1) * 4 * Np + 40 * 128 * 4 * n_tiles,
    )

    out = pl.pallas_call(
        functools.partial(pinn_kernel, act_dtype=act_dtype),
        out_shape=jax.ShapeDtypeStruct((1, Np), jnp.float32),
        grid=(n_tiles,),
        in_specs=[
            pl.BlockSpec((2, tm_eff), lambda i: (0, i)),      # fused x/t, lane-dense
            pl.BlockSpec((40, 128), lambda i: (0, 0)),        # packed params (constant)
        ],
        out_specs=pl.BlockSpec((1, tm_eff), lambda i: (0, i)),
        compiler_params=pltpu.CompilerParams(
            dimension_semantics=("parallel",)),
        cost_estimate=cost,
    )(X, slab)

    return out[:, :N].T                                       # (N, 1)


def xavier_uniform(key, in_dim, out_dim):
    # matches torch.nn.init.xavier_uniform_ (gain=1) on a (out, in) weight.
    bound = jnp.sqrt(6.0 / (in_dim + out_dim))
    return jax.random.uniform(key, (out_dim, in_dim), jnp.float32, -bound, bound)


def init_params(key, layers):
    params = []
    for in_dim, out_dim in zip(layers[:-1], layers[1:]):
        key, wk = jax.random.split(key)
        w = xavier_uniform(wk, in_dim, out_dim)               # (out, in)
        b = jnp.zeros((out_dim, 1), jnp.float32)              # nn.init.zeros_(bias)
        params += [w, b]
    return tuple(params)


def pinn_reference(x, t, lb, ub, params):
    """Pure-JAX reference of PINNBase.forward for validation."""
    X = jnp.concatenate([x, t], axis=-1)
    Xn = 2.0 * (X - lb) / (ub - lb) - 1.0
    w1, b1, w2, b2, w3, b3 = params
    h = jnp.tanh(Xn @ w1.T + b1.T)
    h = jnp.tanh(h @ w2.T + b2.T)
    return h @ w3.T + b3.T


if __name__ == "__main__":
    key = jax.random.PRNGKey(0)
    k_params, k_x, k_t = jax.random.split(key, 3)

    # domain bounds, as in PINNBase.__init__(lb=..., ub=...)
    lb = jnp.asarray([-1.0, 0.0], jnp.float32)
    ub = jnp.asarray([1.0, 1.0], jnp.float32)

    params = init_params(k_params, LAYERS)

    # physics parameters (unused by forward, kept for module parity)
    physics = {"lambda1": jnp.zeros((1,), jnp.float32),
               "lambda2": jnp.asarray([6.0], jnp.float32)}

    # Demo: N=1024 -> auto tile 512, 2 grid steps (keeps both v7x TCs busy).
    N = 1024
    x = jax.random.uniform(k_x, (N, 1), jnp.float32, lb[0], ub[0])
    t = jax.random.uniform(k_t, (N, 1), jnp.float32, lb[1], ub[1])

    act_dtype = _default_act_dtype()
    out = pinn_forward(x, t, lb, ub, params, act_dtype=act_dtype)
    out = jax.block_until_ready(out)

    ref = pinn_reference(x, t, lb, ub, params)
    assert out.shape == (N, 1)
    if act_dtype == jnp.float32:
        tol = dict(atol=1e-5, rtol=1e-5)
    else:  # bf16 activations (v6e/v7x) loosen the tolerance
        tol = dict(atol=5e-2, rtol=5e-2)
    assert jnp.allclose(out, ref, **tol), "mismatch vs. reference"

    print("KERNEL_OK")
</pallas_src>

<mosaic_0001>
module attributes {stable_mosaic.version = 11 : i64} {
  func.func @pinn_kernel(%arg0: i32, %arg1: memref<2x512xf32, #tpu.memory_space<vmem>>, %arg2: memref<40x128xf32, #tpu.memory_space<vmem>>, %arg3: memref<1x512xf32, #tpu.memory_space<vmem>>) attributes {dimension_semantics = [#tpu.dimension_semantics<parallel>], iteration_bounds = array<i64: 2>, scalar_prefetch = 0 : i64, scratch_operands = 0 : i64, tpu.core_type = #tpu.core_type<tc>, window_params = [{transform_indices = @transform_0, window_bounds = array<i64: 2, 512>}, {pipeline_mode = #tpu.pipeline_mode<synchronous>, transform_indices = @transform_1, window_bounds = array<i64: 40, 128>}, {transform_indices = @transform_2, window_bounds = array<i64: 1, 512>}]} {
    %c0 = arith.constant 0 : index
    %c0_0 = arith.constant 0 : index
    %0 = vector.load %arg2[%c0, %c0_0] : memref<40x128xf32, #tpu.memory_space<vmem>>, vector<40x128xf32>
    %1 = vector.extract_strided_slice %0 {offsets = [0, 0], sizes = [32, 32], strides = [1, 1]} : vector<40x128xf32> to vector<32x32xf32>
    %2 = vector.extract_strided_slice %0 {offsets = [0, 32], sizes = [32, 2], strides = [1, 1]} : vector<40x128xf32> to vector<32x2xf32>
    %3 = vector.extract_strided_slice %0 {offsets = [0, 34], sizes = [32, 1], strides = [1, 1]} : vector<40x128xf32> to vector<32x1xf32>
    %4 = vector.extract_strided_slice %0 {offsets = [0, 35], sizes = [32, 1], strides = [1, 1]} : vector<40x128xf32> to vector<32x1xf32>
    %5 = vector.extract_strided_slice %0 {offsets = [32, 0], sizes = [1, 32], strides = [1, 1]} : vector<40x128xf32> to vector<1x32xf32>
    %6 = vector.extract_strided_slice %0 {offsets = [32, 32], sizes = [1, 1], strides = [1, 1]} : vector<40x128xf32> to vector<1x1xf32>
    %c0_1 = arith.constant 0 : index
    %c0_2 = arith.constant 0 : index
    %7 = vector.load %arg1[%c0_1, %c0_2] : memref<2x512xf32, #tpu.memory_space<vmem>>, vector<1x512xf32>
    %c1 = arith.constant 1 : index
    %c0_3 = arith.constant 0 : index
    %8 = vector.load %arg1[%c1, %c0_3] : memref<2x512xf32, #tpu.memory_space<vmem>>, vector<1x512xf32>
    %9 = vector.extract_strided_slice %2 {offsets = [0, 0], sizes = [32, 1], strides = [1, 1]} : vector<32x2xf32> to vector<32x1xf32>
    %10 = vector.broadcast %9 : vector<32x1xf32> to vector<32x512xf32>
    %11 = vector.broadcast %7 : vector<1x512xf32> to vector<32x512xf32>
    %12 = arith.mulf %10, %11 : vector<32x512xf32>
    %13 = vector.extract_strided_slice %2 {offsets = [0, 1], sizes = [32, 1], strides = [1, 1]} : vector<32x2xf32> to vector<32x1xf32>
    %14 = vector.broadcast %13 : vector<32x1xf32> to vector<32x512xf32>
    %15 = vector.broadcast %8 : vector<1x512xf32> to vector<32x512xf32>
    %16 = arith.mulf %14, %15 : vector<32x512xf32>
    %17 = arith.addf %12, %16 : vector<32x512xf32>
    %18 = vector.broadcast %3 : vector<32x1xf32> to vector<32x512xf32>
    %19 = arith.addf %17, %18 : vector<32x512xf32>
    %20 = math.tanh %19 : vector<32x512xf32>
    %cst = arith.constant dense<0.000000e+00> : vector<32x512xf32>
    %21 = tpu.matmul %1, %20, %cst {dimension_numbers = #tpu.dot_dimension_numbers<[1], [0], [0], [1], [0, 0, 1, 1], [], []>} : vector<32x32xf32>, vector<32x512xf32>, vector<32x512xf32> -> vector<32x512xf32>
    %22 = vector.broadcast %4 : vector<32x1xf32> to vector<32x512xf32>
    %23 = arith.addf %21, %22 : vector<32x512xf32>
    %24 = math.tanh %23 : vector<32x512xf32>
    %cst_4 = arith.constant dense<0.000000e+00> : vector<1x512xf32>
    %25 = tpu.matmul %5, %24, %cst_4 {dimension_numbers = #tpu.dot_dimension_numbers<[1], [0], [0], [1], [0, 0, 1, 1], [], []>} : vector<1x32xf32>, vector<32x512xf32>, vector<1x512xf32> -> vector<1x512xf32>
    %26 = vector.broadcast %6 : vector<1x1xf32> to vector<1x512xf32>
    %27 = arith.addf %25, %26 : vector<1x512xf32>
    %c0_5 = arith.constant 0 : index
    %c0_6 = arith.constant 0 : index
    %28 = vector.load %arg3[%c0_5, %c0_6] : memref<1x512xf32, #tpu.memory_space<vmem>>, vector<1x512xf32>
    tpu.vector_store %arg3[%c0_5, %c0_6], %27 {strides = array<i32>} : memref<1x512xf32, #tpu.memory_space<vmem>>, vector<1x512xf32>,
    return
  }
  func.func @transform_0(%arg0: i32) -> (i32, i32) {
    %c0_i32 = arith.constant 0 : i32
    %c0_i32_0 = arith.constant 0 : i32
    return %c0_i32, %arg0 : i32, i32
  }
  func.func @transform_1(%arg0: i32) -> (i32, i32) {
    %c0_i32 = arith.constant 0 : i32
    %c0_i32_0 = arith.constant 0 : i32
    %c0_i32_1 = arith.constant 0 : i32
    return %c0_i32, %c0_i32_0 : i32, i32
  }
  func.func @transform_2(%arg0: i32) -> (i32, i32) {
    %c0_i32 = arith.constant 0 : i32
    %c0_i32_0 = arith.constant 0 : i32
    return %c0_i32, %arg0 : i32, i32
  }
}

</mosaic_0001>

<bundles_post_ra>
// kernel: tpu_custom_call.1
= control target key start
LH: loop header
LB: loop body
LE: loop exit
PB: predicated region body
PF: predicated region fallthrough
CT: control target
= control target key end

     0   :  { %7 = vsyncpa [#allocation3], 0  ;;  %s1267_s0 = inlined_call_operand.hbm [shape: f32[2,1024], index: 0, kind: input, shape index: {}]   ;;  %s1268_s1 = inlined_call_operand.hbm [shape: f32[40,128], index: 1, kind: input, shape index: {}]   ;;  %s1269_s2 = inlined_call_operand.hbm [shape: f32[1,1024], index: 2, kind: output, shape index: {}]  }
   0x1   :  { %9 = vsyncpa [#allocation3 + $0x1], 0 }
   0x2   :  { %10 = vsyncpa [#allocation6], 0 }
   0x3   :  { %11 = vsyncpa [#allocation4], 0 }
   0x4   :  { %13 = vsyncpa [#allocation4 + $0x1], 0  ;;  %s1029_s9 = smov 0   ;;  %s1031_s10 = smov 0  }
   0x5   :  { %s1033_s11 = smov 0   ;;  %s1035_s12 = smov 0  }
   0x6 LB: > { %s108_s15 = sshll.u32 %s1268_s1, 4  ;;  %s1053_s16 = sadd.s32 4294967295, %s1005_s12   ;;  %s1005_s12 = sphi %s1035_s12, %s1279_s12   ;;  %s1001_s11 = sphi %s1033_s11, %s1278_s11   ;;  %s997_s10 = sphi %s1031_s10, %s1277_s10   ;;  %s993_s9 = sphi %s1029_s9, %s1276_s9   ;;  %s109_s15 = int_to_ptr.hbm [resolvable:$true] %s108_s15 }
   0x7   : > { %p699_p0 = scmp.ge.s32.totalorder %s1005_s12, 1  ;;  %p40_p1 = scmp.eq.s32.totalorder %s1053_s16, 0 }
   0x8   : > { %p97_p2 = scmp.lt.s32.totalorder %s1005_s12, 3  ;;  %s1007_s18 = smov [#allocation5]  }
   0x9   : > { %s110_s19 = sshll.u32 %s1007_s18, 4  ;;  %s1008_s20 = smov 128   ;;  %s111_s19 = int_to_ptr.vmem [resolvable:$true] %s110_s19 }
   0xa   : > { %p1058_p3 = pnand %p699_p0, %p97_p2  ;;  %s1009_s21 = smov 8  }
   0xb   : > { %s698_s22 = sadd.s32 4294967294, %s1005_s12   ;;  %s1069_s23 = sadd.s32 1, %s1005_s12  }
   0xc   : > { %p743_p4 = pneg %p1058_p3  ;;  %s26_s24 = sadd.s32 1, %s1001_s11 }
   0xd   : > { %s23_s25 = ssub.s32 %s1005_s12, %s1069_s23  ;;  %p33_p7 = scmp.ne.s32.totalorder %s1001_s11, %s997_s10 }
   0xe   : > { %p744_p6 = pnand %p743_p4, %p40_p1  ;;  %p24_p8 = scmp.eq.s32.totalorder %s23_s25, 0 }
   0xf   : > { %p34_p9 = scmp.eq.s32.totalorder %s1005_s12, 0  ;;  %p39_p10 = scmp.ne.s32.totalorder %s997_s10, %s993_s9 }
  0x10   : > { %746 = dma.hbm_to_vmem [thread:$0]  (!%p744_p6), %s109_s15, 640, %s111_s19, [#allocation6], %s1008_s20, %s1008_s20, %s1009_s21  }
  0x11   : > { %p84_p11 = scmp.eq.s32.totalorder %s1053_s16, 1  ;;  %p1085_p12 = por %p40_p1, %p39_p10 }
  0x12   : > { %s1081_s26 = scalar_select %p24_p8, %s1001_s11, %s26_s24  }
  0x13   : > { %p1089_p13 = por %p84_p11, %p33_p7  ;;  %p90_p0 = scmp.eq.s32.totalorder %s698_s22, 1 }
  0x14   : > { %p35_p2 = por %p34_p9, %p33_p7  ;;  %s124_s29 = sand.u32 1, %s1001_s11  }
  0x15   : > { %p1094_p4 = por %p90_p0, %p39_p10  ;;  %p756_p6 = scmp.lt.s32.totalorder %s1005_s12, 2 }
  0x16   : > { %s702_s3 = sshll.u32 %s124_s29, 3  ;;  %s734_s4 = sshll.u32 %s1005_s12, 3 }
  0x17   : > { %s133_s7 = scalar_lea.hbm %s1267_s0, %s734_s4  ;;  %s128_s13 = scalar_lea.vmem [#allocation2], %s702_s3 }
  0x18   : > { %s135_s8 = sshll.u32 %s133_s7, 4  ;;  %s137_s14 = sshll.u32 %s128_s13, 4  ;;  %s136_s8 = int_to_ptr.hbm [resolvable:$true] %s135_s8  ;;  %s138_s14 = int_to_ptr.vmem [resolvable:$true] %s137_s14 }
  0x19   : > { %p1103_p8 = pnand %p756_p6, %p35_p2  ;;  %s125_s18 = scalar_lea.sflag [#allocation3], %s124_s29 }
  0x1a   : > { %s905_s19 = sshra.s32 %s136_s8, 4  ;;  %s912_s24 = scalar_lea.hbm %s1267_s0, 16  ;;  %s906_s19 = int_to_ptr.hbm [resolvable:$true] %s905_s19 }
  0x1b   : > { %s907_s20 = scalar_lea.hbm %s906_s19, 8  ;;  %p909_p9 = pneg %p1103_p8 }
  0x1c   : > { %p908_p7 = scmp.ne.s32.totalorder %s906_s19, %s907_s20  ;;  %p913_p0 = scmp.lt.s32.totalorder %s906_s19, %s1267_s0 }
  0x1d   : > { %p914_p2 = scmp.lt.s32.totalorder %s912_s24, %s907_s20 }
  0x1e   : > { %p910_p10 = pnand %p909_p9, %p908_p7 }
  0x1f   : > { %p915_p6 = por %p914_p2, %p913_p0 }
  0x20   : > { %p911_p11 = pneg %p910_p10 }
  0x22   : > { %p916_p5 = pnand %p915_p6, %p911_p11 }
  0x24   : > { %919 = shalt.err (!%p916_p5)
}
  0x25   : > { %750 = dma.hbm_to_vmem [thread:$0]  (!%p1103_p8), %s136_s8, 128, %s138_s14, %s125_s18  }
  0x26   : > { %146 = sbr.rel (%p1058_p3) target bundleno = 521 (0x209), region = 28  ;;  %s1120_s29 = sand.u32 (!%p1058_p3), 1, %s997_s10  }
  0x27   : > { %s706_s4 = sshll.u32 (!%p1058_p3), %s1120_s29, 3  ;;  %s149_s5 = scalar_lea.sflag (!%p1058_p3), [#allocation3], %s1120_s29 }
  0x28   : > { %s1124_s6 = scalar_lea.vmem (!%p1058_p3), [#allocation2], %s706_s4 }
  0x2b   : > { %980 = dma.done.wait (%p1085_p12), %s149_s5, 128  }
  0x2c   : > { %982 = vsyncadd (%p1085_p12), %s149_s5, 4294967168 }
  0x2d   : > { %984 = dma.done.wait (%p40_p1), [#allocation6], 640  }
  0x2e   : > { %986 = vsyncadd (%p40_p1), [#allocation6], 4294966656  ;;  %v1010_v0 = vmov 32   ;;  %v1134_v1 = vld [vmem:[#allocation5 + $0x18] sm:$0xff]  ;;  %v1136_v2 = vld [vmem:[#allocation5 + $0x10] sm:$0xff]  ;;  %v1011_v4 = vmov 33  }
  0x2f   : > { %800 = vset.pattern.permute.xlu1 %v1010_v0  ;;  %798 = vset.pattern.permute.xlu0 %v1010_v0  ;;  %v1138_v3 = vld [vmem:[#allocation5 + $0x8] sm:$0xff]  ;;  %v1146_v5 = vld [vmem:[#allocation5] sm:$0xff]  ;;  %v1012_v6 = vmov 34   ;;  %v186_v9 = vld [vmem:[%s1124_s6] ss:$2 sm:$0xf] }
  0x30   : > { %802 = vset.pattern.permute.xlu2 %v1010_v0  ;;  %206 = vperm.xlu0 %798, %v1134_v1   ;;  %v709_v10 = vld [vmem:[%s1124_s6 + $0x1] ss:$2 sm:$0xf]  ;;  %v210_v14 = vperm.slane %v186_v9, 0  ;;  %v211_v16 = vperm.slane %v186_v9, 1  ;;  %v212_v20 = vperm.slane %v186_v9, 2 }
  0x31   : > { %201 = vperm.xlu1 %800, %v1136_v2   ;;  %196 = vperm.xlu2 %802, %v1138_v3   ;;  %v251_v15 = vperm.slane %v709_v10, 0  ;;  %v1160_v17 = vperm.slane %v709_v10, 1  ;;  %v253_v23 = vperm.slane %v709_v10, 2  ;;  %v1163_v26 = vperm.slane %v186_v9, 3  ;;  %s708_s17 = sshll.u32 %s1120_s29, 2  ;;  %s731_s27 = sshll.u32 %s1053_s16, 2 }
  0x32   : > { %v1165_v27 = vperm.slane %v709_v10, 3  ;;  %vm355_vm0 = vcmask 261120   ;;  %s613_s13 = scalar_lea.hbm %s1269_s2, %s731_s27  ;;  %vm592_vm1 = vcmask 1042434   ;;  %vm590_vm2 = vcmask 1040384   ;;  %s178_s14 = scalar_lea.vmem [#allocation7], %s708_s17 }
  0x33   : > { %s615_s15 = sshll.u32 %s178_s14, 4  ;;  %s617_s16 = sshll.u32 %s613_s13, 4  ;;  %vm594_vm3 = vcmask 1041408   ;;  %s616_s15 = int_to_ptr.vmem [resolvable:$true] %s615_s15  ;;  %s618_s16 = int_to_ptr.hbm [resolvable:$true] %s617_s16 }
  0x34   : > { %s603_s18 = scalar_lea.sflag [#allocation4], %s1120_s29  ;;  %s949_s19 = sshra.s32 %s618_s16, 4  ;;  %s950_s19 = int_to_ptr.hbm [resolvable:$true] %s949_s19 }
  0x35   : > { %s951_s20 = scalar_lea.hbm %s950_s19, 4  ;;  %s955_s24 = scalar_lea.hbm %s1269_s2, 8 }
  0x36   : > { %p952_p1 = scmp.ne.s32.totalorder %s950_s19, %s951_s20  ;;  %p956_p12 = scmp.lt.s32.totalorder %s950_s19, %s1269_s2 }
  0x37   : > { %p957_p8 = scmp.lt.s32.totalorder %s955_s24, %s951_s20 }
  0x38   : > { %799 = vset.pattern.permute.xlu0 %v1011_v4  ;;  %p953_p3 = pnand %p952_p1, %p1089_p13 }
  0x39   : > { %801 = vset.pattern.permute.xlu1 %v1011_v4  ;;  %247 = vperm.xlu0 %799, %v1134_v1   ;;  %p958_p7 = por %p957_p8, %p956_p12 }
  0x3a   : > { %243 = vperm.xlu1 %801, %v1136_v2   ;;  %803 = vset.pattern.permute.xlu2 %v1011_v4  ;;  %p954_p5 = pneg %p953_p3 }
  0x3b   : > { %239 = vperm.xlu2 %803, %v1138_v3  }
  0x3c   : > { %p959_p9 = pnand %p958_p7, %p954_p5 }
  0x41   : > { %235 = vperm.xlu0 %799, %v1146_v5  }
  0x42   : > { %804 = vset.pattern.permute.xlu1 %v1012_v6 }
  0x43   : > { %304 = vperm.xlu1 %804, %v1134_v1   ;;  %805 = vset.pattern.permute.xlu2 %v1010_v0 }
  0x44   : > { %191 = vperm.xlu2 %805, %v1146_v5  }
  0x49   : > { %807 = vset.pattern.permute.xlu0 %v1012_v6 }
  0x4a   : > { %292 = vperm.xlu0 %807, %v1146_v5  }
  0x4b   : > { %300 = vperm.xlu1 %804, %v1136_v2  }
  0x4c   : > { %806 = vset.pattern.permute.xlu2 %v1012_v6  ;;  %v1013_v6 = vmov 35  }
  0x4d   : > { %296 = vperm.xlu2 %806, %v1138_v3  }
  0x52   : > { %810 = vset.pattern.permute.xlu0 %v1010_v0 }
  0x53   : > { %808 = vset.pattern.permute.xlu1 %v1013_v6 }
  0x54   : > { %352 = vperm.xlu1 %808, %v1134_v1  }
  0x55   : > { %809 = vset.pattern.permute.xlu2 %v1013_v6 }
  0x56   : > { %348 = vperm.xlu2 %809, %v1136_v2  }
  0x5c   : > { %344 = vperm.xlu1 %808, %v1138_v3  }
  0x5e   : > { %340 = vperm.xlu2 %809, %v1146_v5  }
  0x8b   : > { %v197_v7 = vpop.permute.xlu2 %196 }
  0x8c   : > { %v222_v18 = vmul.f32 %v210_v14, %v197_v7  ;;  %v223_v21 = vmul.f32 %v211_v16, %v197_v7  ;;  %v224_v29 = vmul.f32 %v212_v20, %v197_v7  ;;  %v225_v36 = vmul.f32 %v1163_v26, %v197_v7 }
  0x95   : > { %v240_v8 = vpop.permute.xlu2 %239 }
  0x96   : > { %v263_v19 = vmul.f32 %v251_v15, %v240_v8  ;;  %v264_v22 = vmul.f32 %v1160_v17, %v240_v8  ;;  %v265_v32 = vmul.f32 %v253_v23, %v240_v8  ;;  %v266_v37 = vmul.f32 %v1165_v27, %v240_v8 }
  0x98   : > { %v279_v28 = vadd.f32 %v263_v19, %v222_v18  ;;  %v280_v30 = vadd.f32 %v264_v22, %v223_v21  ;;  %v281_v45 = vadd.f32 %v265_v32, %v224_v29  ;;  %v282_v52 = vadd.f32 %v266_v37, %v225_v36 }
  0x9e   : > { %v1158_v13 = vpop.permute.xlu2 %191 }
  0x9f   : > { %v218_v50 = vmul.f32 %v210_v14, %v1158_v13  ;;  %v219_v51 = vmul.f32 %v211_v16, %v1158_v13  ;;  %v220_v58 = vmul.f32 %v212_v20, %v1158_v13 }
  0xa2   : > { %v207_v12 = vpop.permute.xlu0 %206 }
  0xa3   : > { %v1156_v11 = vpop.permute.xlu1 %201  ;;  %v230_v40 = vmul.f32 %v210_v14, %v207_v12  ;;  %v231_v41 = vmul.f32 %v211_v16, %v207_v12  ;;  %v232_v42 = vmul.f32 %v212_v20, %v207_v12  ;;  %v233_v44 = vmul.f32 %v1163_v26, %v207_v12 }
  0xa4   : > { %v226_v63 = vmul.f32 %v210_v14, %v1156_v11  ;;  %v227_v7 = vmul.f32 %v211_v16, %v1156_v11  ;;  %v228_v8 = vmul.f32 %v212_v20, %v1156_v11  ;;  %v229_v10 = vmul.f32 %v1163_v26, %v1156_v11 }
  0xa7   : > { %v297_v31 = vpop.permute.xlu2 %296 }
  0xa8   : > { %v311_v39 = vadd.f32 %v297_v31, %v279_v28  ;;  %v312_v43 = vadd.f32 %v297_v31, %v280_v30  ;;  %v313_v0 = vadd.f32 %v297_v31, %v281_v45  ;;  %v314_v12 = vadd.f32 %v297_v31, %v282_v52 }
  0xaa   : > { %811 = vtanh.f32 %v311_v39 }
  0xab   : > { %v248_v24 = vpop.permute.xlu0 %247  ;;  %813 = vtanh.f32 %v312_v43 }
  0xac   : > { %v244_v25 = vpop.permute.xlu1 %243  ;;  %v271_v33 = vmul.f32 %v251_v15, %v248_v24  ;;  %v272_v34 = vmul.f32 %v1160_v17, %v248_v24  ;;  %v273_v35 = vmul.f32 %v253_v23, %v248_v24  ;;  %v274_v38 = vmul.f32 %v1165_v27, %v248_v24 }
  0xad   : > { %v267_v59 = vmul.f32 %v251_v15, %v244_v25  ;;  %v268_v61 = vmul.f32 %v1160_v17, %v244_v25  ;;  %v269_v62 = vmul.f32 %v253_v23, %v244_v25  ;;  %v270_v4 = vmul.f32 %v1165_v27, %v244_v25 }
  0xae   : > { %v287_v47 = vadd.f32 %v271_v33, %v230_v40  ;;  %v288_v48 = vadd.f32 %v272_v34, %v231_v41  ;;  %v289_v49 = vadd.f32 %v273_v35, %v232_v42  ;;  %v290_v54 = vadd.f32 %v274_v38, %v233_v44 }
  0xaf   : > { %v283_v21 = vadd.f32 %v267_v59, %v226_v63  ;;  %v284_v22 = vadd.f32 %v268_v61, %v227_v7  ;;  %v285_v16 = vadd.f32 %v269_v62, %v228_v8  ;;  %v286_v25 = vadd.f32 %v270_v4, %v229_v10 }
  0xb0   : > { %v812_v18 = vpop.eup %811 }
  0xb1   : > { %v814_v24 = vpop.eup %813 }
  0xb3   : > { %v236_v46 = vpop.permute.xlu0 %235 }
  0xb4   : > { %v259_v9 = vmul.f32 %v251_v15, %v236_v46  ;;  %v260_v14 = vmul.f32 %v1160_v17, %v236_v46  ;;  %v261_v19 = vmul.f32 %v253_v23, %v236_v46  ;;  %v221_v15 = vmul.f32 %v1163_v26, %v1158_v13 }
  0xb5   : > { %v305_v53 = vpop.permute.xlu1 %304  ;;  %v262_v20 = vmul.f32 %v1165_v27, %v236_v46 }
  0xb6   : > { %v319_v55 = vadd.f32 %v305_v53, %v287_v47  ;;  %v320_v56 = vadd.f32 %v305_v53, %v288_v48  ;;  %v321_v57 = vadd.f32 %v305_v53, %v289_v49  ;;  %v322_v60 = vadd.f32 %v305_v53, %v290_v54  ;;  %v349_v54 = vpop.permute.xlu2 %348 }
  0xb7   : > { %v275_v32 = vadd.f32 %v259_v9, %v218_v50  ;;  %v276_v34 = vadd.f32 %v260_v14, %v219_v51  ;;  %v277_v36 = vadd.f32 %v261_v19, %v220_v58  ;;  %v278_v27 = vadd.f32 %v262_v20, %v221_v15  ;;  %v1222_v58 = vld [vmem:[#allocation5 + $0x20] sm:$0xff] }
  0xb8   : > { %815 = vtanh.f32 %v319_v55  ;;  %498 = vperm.xlu0 %810, %v1222_v58  }
  0xb9   : > { %817 = vtanh.f32 %v320_v56 }
  0xba   : > { %819 = vtanh.f32 %v321_v57 }
  0xbb   : > { %821 = vtanh.f32 %v322_v60 }
  0xbc   : > { %823 = vtanh.f32 %v313_v0  ;;  %v293_v29 = vpop.permute.xlu0 %292 }
  0xbd   : > { %v301_v28 = vpop.permute.xlu1 %300  ;;  %825 = vtanh.f32 %v314_v12  ;;  %v307_v13 = vadd.f32 %v293_v29, %v275_v32  ;;  %v308_v37 = vadd.f32 %v293_v29, %v276_v34  ;;  %v309_v38 = vadd.f32 %v293_v29, %v277_v36 }
  0xbe   : > { %v816_v11 = vpop.eup %815  ;;  %v315_v30 = vadd.f32 %v301_v28, %v283_v21  ;;  %v316_v31 = vadd.f32 %v301_v28, %v284_v22  ;;  %v317_v17 = vadd.f32 %v301_v28, %v285_v16  ;;  %v318_v23 = vadd.f32 %v301_v28, %v286_v25  ;;  %v341_v4 = vpop.permute.xlu2 %340 }
  0xbf   : > { %v818_v33 = vpop.eup %817  ;;  %376 = vmatpush.msra.mxu0 %v816_v11  ;;  %v310_v40 = vadd.f32 %v293_v29, %v278_v27 }
  0xc0   : > { %v820_v35 = vpop.eup %819  ;;  %827 = vtanh.f32 %v315_v30  ;;  %405 = vmatpush.msra.mxu1 %v818_v33 }
  0xc1   : > { %v822_v26 = vpop.eup %821  ;;  %829 = vtanh.f32 %v316_v31  ;;  %434 = vmatpush.msra.mxu2 %v820_v35 }
  0xc2   : > { %831 = vtanh.f32 %v317_v17  ;;  %463 = vmatpush.msra.mxu3 %v822_v26  ;;  %v824_v39 = vpop.eup %823 }
  0xc3   : > { %833 = vtanh.f32 %v318_v23  ;;  %v826_v41 = vpop.eup %825 }
  0xc4   : > { %835 = vtanh.f32 %v307_v13 }
  0xc5   : > { %837 = vtanh.f32 %v308_v37 }
  0xc6   : > { %v828_v42 = vpop.eup %827  ;;  %839 = vtanh.f32 %v309_v38  ;;  %v353_v59 = vpop.permute.xlu1 %352 }
  0xc7   : > { %v830_v43 = vpop.eup %829  ;;  %841 = vtanh.f32 %v310_v40  ;;  %377 = vmatpush.msra.mxu0 %v828_v42 }
  0xc8   : > { %v832_v44 = vpop.eup %831  ;;  %406 = vmatpush.msra.mxu1 %v830_v43 }
  0xc9   : > { %v834_v45 = vpop.eup %833  ;;  %435 = vmatpush.msra.mxu2 %v832_v44  ;;  %378 = vmatpush.msra.mxu0 %v812_v18 }
  0xca   : > { %v836_v46 = vpop.eup %835  ;;  %464 = vmatpush.msra.mxu3 %v834_v45  ;;  %407 = vmatpush.msra.mxu1 %v814_v24 }
  0xcb   : > { %v838_v47 = vpop.eup %837  ;;  %436 = vmatpush.msra.mxu2 %v824_v39  ;;  %379 = vmatpush.msra.mxu0 %v836_v46  ;;  %v597_v46 = vlaneseq }
  0xcc   : > { %v840_v48 = vpop.eup %839  ;;  %465 = vmatpush.msra.mxu3 %v826_v41  ;;  %408 = vmatpush.msra.mxu1 %v838_v47 }
  0xcd   : > { %v842_v49 = vpop.eup %841  ;;  %437 = vmatpush.msra.mxu2 %v840_v48  ;;  %710 = vmatmul.msk.f32.vlgmr.msra.gmra.mxu0 %vm355_vm0, %v1146_v5  ;;  %vm599_vm4 = vcmp.lt.s32.totalorder %v597_v46, 512 }
  0xce   : > { %466 = vmatpush.msra.mxu3 %v842_v49  ;;  %714 = vmatmul.msk.f32.vlgmr.msra.gmra.mxu1 %vm355_vm0, %v1146_v5  ;;  %v345_v10 = vpop.permute.xlu1 %344 }
  0xcf   : > { %718 = vmatmul.msk.f32.vlgmr.msra.gmra.mxu2 %vm355_vm0, %v1146_v5  ;;  %722 = vmatmul.msk.f32.vlgmr.msra.gmra.mxu3 %vm355_vm0, %v1146_v5 }
  0xd5   : > { %711 = vmatmul.msk.f32.gmra.mxu0 %vm355_vm0, %v1138_v3 }
  0xd6   : > { %715 = vmatmul.msk.f32.gmra.mxu1 %vm355_vm0, %v1138_v3 }
  0xd7   : > { %719 = vmatmul.msk.f32.gmra.mxu2 %vm355_vm0, %v1138_v3  ;;  %723 = vmatmul.msk.f32.gmra.mxu3 %vm355_vm0, %v1138_v3 }
  0xdd   : > { %712 = vmatmul.msk.f32.gmra.mxu0 %vm355_vm0, %v1136_v2 }
  0xde   : > { %716 = vmatmul.msk.f32.gmra.mxu1 %vm355_vm0, %v1136_v2 }
  0xdf   : > { %720 = vmatmul.msk.f32.gmra.mxu2 %vm355_vm0, %v1136_v2  ;;  %724 = vmatmul.msk.f32.gmra.mxu3 %vm355_vm0, %v1136_v2 }
  0xe5   : > { %713 = vmatmul.msk.f32.gmra.mxu0 %vm355_vm0, %v1134_v1 }
  0xe6   : > { %717 = vmatmul.msk.f32.gmra.mxu1 %vm355_vm0, %v1134_v1 }
  0xe7   : > { %721 = vmatmul.msk.f32.gmra.mxu2 %vm355_vm0, %v1134_v1  ;;  %725 = vmatmul.msk.f32.gmra.mxu3 %vm355_vm0, %v1134_v1 }
 0x12a   : > { %v499_v39 = vpop.permute.xlu0 %498 }
 0x14a   : > { %v381_v3 = vpop.f32.mrf.mxu0 }
 0x14b   : > { %v410_v5 = vpop.f32.mrf.mxu1  ;;  %v382_v8 = vadd.f32 %v381_v3, %v341_v4 }
 0x14c   : > { %v411_v9 = vadd.f32 %v410_v5, %v341_v4 }
 0x152   : > { %v439_v50 = vpop.f32.mrf.mxu2  ;;  %v468_v51 = vpop.f32.mrf.mxu3 }
 0x153   : > { %v384_v52 = vpop.f32.mrf.mxu0  ;;  %v413_v53 = vpop.f32.mrf.mxu1  ;;  %v440_v31 = vadd.f32 %v439_v50, %v341_v4  ;;  %v469_v32 = vadd.f32 %v468_v51, %v341_v4 }
 0x154   : > { %v385_v12 = vadd.f32 %v384_v52, %v345_v10  ;;  %v414_v14 = vadd.f32 %v413_v53, %v345_v10 }
 0x15a   : > { %v442_v2 = vpop.f32.mrf.mxu2  ;;  %v471_v55 = vpop.f32.mrf.mxu3 }
 0x15b   : > { %v387_v56 = vpop.f32.mrf.mxu0  ;;  %v416_v57 = vpop.f32.mrf.mxu1  ;;  %v443_v28 = vadd.f32 %v442_v2, %v345_v10  ;;  %v472_v11 = vadd.f32 %v471_v55, %v345_v10 }
 0x15c   : > { %v388_v60 = vadd.f32 %v387_v56, %v349_v54  ;;  %v417_v61 = vadd.f32 %v416_v57, %v349_v54 }
 0x15e   : > { %843 = vtanh.f32 %v388_v60 }
 0x15f   : > { %845 = vtanh.f32 %v417_v61 }
 0x162   : > { %v445_v62 = vpop.f32.mrf.mxu2  ;;  %v474_v1 = vpop.f32.mrf.mxu3 }
 0x163   : > { %v390_v63 = vpop.f32.mrf.mxu0  ;;  %v419_v0 = vpop.f32.mrf.mxu1  ;;  %v446_v22 = vadd.f32 %v445_v62, %v349_v54  ;;  %v475_v20 = vadd.f32 %v474_v1, %v349_v54 }
 0x164   : > { %v391_v6 = vadd.f32 %v390_v63, %v353_v59  ;;  %v420_v7 = vadd.f32 %v419_v0, %v353_v59  ;;  %v844_v21 = vpop.eup %843 }
 0x165   : > { %v846_v15 = vpop.eup %845 }
 0x166   : > { %847 = vtanh.f32 %v391_v6 }
 0x167   : > { %849 = vtanh.f32 %v420_v7 }
 0x168   : > { %851 = vtanh.f32 %v382_v8 }
 0x169   : > { %853 = vtanh.f32 %v411_v9 }
 0x16a   : > { %v448_v18 = vpop.f32.mrf.mxu2  ;;  %v477_v19 = vpop.f32.mrf.mxu3  ;;  %855 = vtanh.f32 %v385_v12 }
 0x16b   : > { %v449_v16 = vadd.f32 %v448_v18, %v353_v59  ;;  %v478_v24 = vadd.f32 %v477_v19, %v353_v59  ;;  %857 = vtanh.f32 %v414_v14 }
 0x16c   : > { %v848_v25 = vpop.eup %847 }
 0x16d   : > { %859 = vtanh.f32 %v449_v16  ;;  %v850_v29 = vpop.eup %849  ;;  %515 = vmatpush.msrb.mxu0 %v848_v25 }
 0x16e   : > { %861 = vtanh.f32 %v478_v24  ;;  %v852_v30 = vpop.eup %851  ;;  %535 = vmatpush.msrb.mxu1 %v850_v29 }
 0x16f   : > { %863 = vtanh.f32 %v446_v22  ;;  %v854_v17 = vpop.eup %853  ;;  %516 = vmatpush.msrb.mxu0 %v844_v21 }
 0x170   : > { %865 = vtanh.f32 %v475_v20  ;;  %v856_v33 = vpop.eup %855  ;;  %536 = vmatpush.msrb.mxu1 %v846_v15 }
 0x171   : > { %867 = vtanh.f32 %v443_v28  ;;  %v858_v23 = vpop.eup %857  ;;  %517 = vmatpush.msrb.mxu0 %v856_v33 }
 0x172   : > { %869 = vtanh.f32 %v472_v11  ;;  %537 = vmatpush.msrb.mxu1 %v858_v23 }
 0x173   : > { %v860_v34 = vpop.eup %859  ;;  %871 = vtanh.f32 %v440_v31  ;;  %518 = vmatpush.msrb.mxu0 %v852_v30 }
 0x174   : > { %v862_v35 = vpop.eup %861  ;;  %873 = vtanh.f32 %v469_v32  ;;  %555 = vmatpush.msrb.mxu2 %v860_v34  ;;  %538 = vmatpush.msrb.mxu1 %v854_v17 }
 0x175   : > { %v864_v36 = vpop.eup %863  ;;  %575 = vmatpush.msrb.mxu3 %v862_v35  ;;  %727 = vmatmul.msk.f32.vlgmr.msrb.gmra.mxu1 %vm355_vm0, %v1222_v58 }
 0x176   : > { %v866_v13 = vpop.eup %865  ;;  %556 = vmatpush.msrb.mxu2 %v864_v36  ;;  %726 = vmatmul.msk.f32.vlgmr.msrb.gmra.mxu0 %vm355_vm0, %v1222_v58 }
 0x177   : > { %v868_v26 = vpop.eup %867  ;;  %576 = vmatpush.msrb.mxu3 %v866_v13 }
 0x178   : > { %v870_v27 = vpop.eup %869  ;;  %557 = vmatpush.msrb.mxu2 %v868_v26 }
 0x179   : > { %v872_v37 = vpop.eup %871  ;;  %577 = vmatpush.msrb.mxu3 %v870_v27 }
 0x17a   : > { %v874_v38 = vpop.eup %873  ;;  %558 = vmatpush.msrb.mxu2 %v872_v37 }
 0x17b   : > { %578 = vmatpush.msrb.mxu3 %v874_v38  ;;  %728 = vmatmul.msk.f32.vlgmr.msrb.gmra.mxu2 %vm355_vm0, %v1222_v58 }
 0x17c   : > { %729 = vmatmul.msk.f32.vlgmr.msrb.gmra.mxu3 %vm355_vm0, %v1222_v58 }
 0x1f2   : > { %v540_v40 = vpop.f32.mrf.mxu1 }
 0x1f3   : > { %v541_v41 = vadd.f32 %v540_v40, %v499_v39  ;;  %v520_v42 = vpop.f32.mrf.mxu0 }
 0x1f4   : > { %v521_v49 = vadd.f32 %v520_v42, %v499_v39 }
 0x1f5   : > { %v587_v47 = vrot.slane %v541_v41, 7 }
 0x1f7   : > { %v591_v51 = vsel %vm590_vm2, %v521_v49, %v587_v47 }
 0x1fe   : > { %v560_v43 = vpop.f32.mrf.mxu2 }
 0x1ff   : > { %v561_v44 = vadd.f32 %v560_v43, %v499_v39  ;;  %v580_v45 = vpop.f32.mrf.mxu3 }
 0x200   : > { %v581_v48 = vadd.f32 %v580_v45, %v499_v39 }
 0x201   : > { %v588_v3 = vrot.slane %v561_v44, 6 }
 0x202   : > { %v589_v5 = vrot.slane %v581_v48, 5 }
 0x204   : > { %v593_v50 = vsel %vm592_vm1, %v588_v3, %v589_v5 }
 0x205   : > { %v595_v52 = vsel %vm594_vm3, %v591_v51, %v593_v50 }
 0x206   : > { %601 = vst.msk [vmem:[%s178_s14] sm:$0xf] %vm599_vm4, %v595_v52 }
 0x207   : > { %962 = shalt.err (!%p959_p9)
}
 0x208   : > { %741 = dma.vmem_to_hbm [thread:$0]  (%p1089_p13), %s616_s15, 64, %s618_s16, %s603_s18  }
 0x209 PF: > { %s629_s29 = sand.u32 1, %s993_s9   ;;  %p1275_p10 = scmp.ge.s32.totalorder %s1005_s12, 2 }
 0x20a   : > { %s630_s4 = scalar_lea.sflag [#allocation4], %s629_s29 }
 0x20b   : > { %p752_p11 = pnand %p1275_p10, %p1094_p4 }
 0x20d   : > { %p753_p0 = pneg %p752_p11 }
 0x20f   : > { %988 = dma.done.wait (%p753_p0), %s630_s4, 64  }
 0x210   : > { %990 = vsyncadd (%p753_p0), %s630_s4, 4294967232  ;;  %p16_p2 = scmp.ge.s32.totalorder %s1069_s23, 4   ;;  %s1276_s9 = smov %s997_s10 }
 0x211   : > { %s1277_s10 = smov %s1001_s11  ;;  %s1278_s11 = smov %s1081_s26 }
 0x212   : > { %s1279_s12 = smov %s1069_s23  ;;  %18 = sbr.rel (!%p16_p2) target bundleno = 6 (0x6), region = 78 }
 0x217   :  { %636 = vsyncpa [#allocation3], 1 }
 0x218   :  { %638 = vsyncpa [#allocation3 + $0x1], 1 }
 0x219   :  { %639 = vsyncpa [#allocation6], 1 }
 0x21a   :  { %640 = vsyncpa [#allocation4], 1 }
 0x21b   :  { %642 = vsyncpa [#allocation4 + $0x1], 1 }

</bundles_post_ra>
